<compile_context>
chip_gen: v6e
topology: v6e:2x2x1
jax: 0.10.0
libtpu: 0.0.40
codegen_flags: <defaults>
</compile_context>

<pallas_src>
import jax
import jax.numpy as jnp
from jax import lax
from jax.experimental import pallas as pl
from jax.experimental.pallas import tpu as pltpu

# ---------------- problem sizes (small, synthetic) ----------------
N, CIN, H, W = 2, 4, 16, 16      # batch, in-channels, spatial
HID = 32                         # hidden channels of the 3x3 conv
NCLS = 8                         # number of segmentation classes
KH = KW = 3
K1 = KH * KW * CIN               # 36 : im2col contraction size
K1E = K1 + 1                     # 37 : + ones row (folds conv1 bias into the MXU)
HIDE = HID + 1                   # 33 : + constant-one row (folds conv2 bias)
HW = H * W                       # 256: lane-dense spatial axis

# Images per grid step.  IMAGES_PER_TILE = N  -> grid=(1,): ONE MXU dot per layer
# for the whole batch (biggest structural win on single-TC v5e/v6e).
# TODO(synk): on v7x set IMAGES_PER_TILE = 1 so grid=(N,) with "parallel"
# semantics shards the lane axis across both TensorCores; at real sizes re-derive
# the lane tile for the 64 MiB VMEM budget instead of using whole images.
IMAGES_PER_TILE = N


def _seg_head_kernel(p_ref, w1e_ref, w2e_ref, out_ref):
    """One grid step = IMAGES_PER_TILE images folded onto the lane axis.

    p_ref   : (K1E, IPT*HW)   bf16 im2col patches + ones row (batch on lanes)
    w1e_ref : (HIDE, K1E)     bf16 [W1^T | b1 ; e_ones]
    w2e_ref : (NCLS, HIDE)    bf16 [W2^T | b2]
    out_ref : (IPT, NCLS, HW) f32 logits, NCHW memory order
    """
    # Layer 1: single MXU dot for the whole tile, f32 accumulation; ReLU on VPU
    # in f32.  The appended "picker" row of W1e reproduces the ones row, which
    # survives the ReLU and carries b2 through the second matmul.
    hid = jnp.dot(w1e_ref[...], p_ref[...], preferred_element_type=jnp.float32)
    hid = jnp.maximum(hid, 0.0)                                   # (HIDE, IPT*HW) f32

    # Layer 2: bf16 MXU operands, f32 accumulation.  M=NCLS=8 is fill/drain
    # bound by construction; the wide lane axis is the only amortizing axis.
    logits = jnp.dot(w2e_ref[...], hid.astype(jnp.bfloat16),
                     preferred_element_type=jnp.float32)          # (NCLS, IPT*HW)

    # Per-image stores: static lane slices at multiples of 256 (vreg aligned, no
    # data movement), each a full lane-dense unmasked (NCLS, 256) store.
    for j in range(out_ref.shape[0]):
        out_ref[j] = logits[:, j * HW:(j + 1) * HW]


def seg_head_pallas(patches_e, w1e, w2e):
    """(K1E, N*HW) bf16 patches -> (N, NCLS, HW) f32 logits (NCHW order)."""
    k1e, lanes = patches_e.shape
    hide = w1e.shape[0]
    ncls = w2e.shape[0]
    n_img = lanes // HW
    ipt = IMAGES_PER_TILE
    assert n_img % ipt == 0
    return pl.pallas_call(
        _seg_head_kernel,
        out_shape=jax.ShapeDtypeStruct((n_img, ncls, HW), jnp.float32),
        grid_spec=pltpu.PrefetchScalarGridSpec(
            num_scalar_prefetch=0,
            grid=(n_img // ipt,),
            in_specs=[
                # lane-tiled patches; weights VMEM-resident across grid steps
                pl.BlockSpec((k1e, ipt * HW), lambda i: (0, i)),
                pl.BlockSpec((hide, k1e), lambda i: (0, 0)),
                pl.BlockSpec((ncls, hide), lambda i: (0, 0)),
            ],
            out_specs=pl.BlockSpec((ipt, ncls, HW), lambda i: (i, 0, 0)),
        ),
        compiler_params=pltpu.CompilerParams(
            dimension_semantics=("parallel",),
            # Allow XLA to fuse the pad/im2col/bf16-cast producer into the input
            # pipeline so the 9x-inflated patch tensor need not hit HBM.
            allow_input_fusion=[True, False, False],
        ),
    )(patches_e, w1e, w2e)


def segmentation_model(x_nchw, params):
    """The wrapped 'model': returns a tuple of outputs (main logits first)."""
    w1, b1, w2, b2 = params
    x = x_nchw.astype(jnp.float32)

    # im2col with the batch folded onto the lane axis: (K1, N*HW), (tap,cin)-major K.
    x_pad = jnp.pad(x, ((0, 0), (0, 0), (1, 1), (1, 1)))
    taps = [x_pad[:, :, dy:dy + H, dx:dx + W]
            for dy in range(KH) for dx in range(KW)]              # 9 x (N,CIN,H,W)
    p = jnp.stack(taps, axis=0)                                   # (9, N, CIN, H, W)
    p = p.transpose(0, 2, 1, 3, 4).reshape(K1, N * HW)            # (36, N*HW)
    ones = jnp.ones((1, N * HW), jnp.float32)
    patches_e = jnp.concatenate([p, ones], axis=0).astype(jnp.bfloat16)   # (37, N*HW)
    # TODO(synk): at real sizes skip host-side im2col entirely — DMA the raw
    # zero-padded input tile and form the 9 taps in-kernel (~9x less HBM read).

    # Fold both biases into the MXU operands (free bias, no in-kernel broadcasts).
    w1t = w1.reshape(K1, HID).T                                   # (HID, K1)
    w1e_top = jnp.concatenate([w1t, b1.reshape(HID, 1)], axis=1)  # (HID, K1E)
    pick_ones = jnp.zeros((1, K1E), jnp.float32).at[0, K1].set(1.0)
    w1e = jnp.concatenate([w1e_top, pick_ones], axis=0).astype(jnp.bfloat16)   # (HIDE, K1E)
    w2e = jnp.concatenate([w2.T, b2.reshape(NCLS, 1)], axis=1).astype(jnp.bfloat16)  # (NCLS, HIDE)

    logits_flat = seg_head_pallas(patches_e, w1e, w2e)            # (N, NCLS, HW)
    logits_nchw = logits_flat.reshape(N, NCLS, H, W)              # already NCHW order
    return (logits_nchw,)


@jax.jit
def segmentation_model_output_wrapper(x_nchw, params):
    """Equivalent of SegmentationModelOutputWrapper.forward: model(x)[0]."""
    return segmentation_model(x_nchw, params)[0]


def _reference(x_nchw, params):
    """Pure-JAX reference mirroring bf16 MXU operands with f32 accumulation."""
    w1, b1, w2, b2 = params
    bf = lambda a: a.astype(jnp.bfloat16).astype(jnp.float32)
    x = jnp.transpose(bf(x_nchw.astype(jnp.float32)), (0, 2, 3, 1))        # NHWC
    w1_hwio = bf(w1).reshape(3, 3, CIN, HID)                               # HWIO
    y = lax.conv_general_dilated(
        x, w1_hwio, window_strides=(1, 1), padding="SAME",
        dimension_numbers=("NHWC", "HWIO", "NHWC"),
        precision=lax.Precision.HIGHEST)
    y = jnp.maximum(y + bf(b1)[0], 0.0)
    y = bf(y)                                                  # hid -> bf16 before 2nd dot
    z = jnp.einsum("nhwc,cd->nhwd", y, bf(w2),
                   precision=lax.Precision.HIGHEST) + bf(b2)[0]
    return jnp.transpose(z, (0, 3, 1, 2))                      # NCHW


if __name__ == "__main__":
    key = jax.random.PRNGKey(0)
    kx, k1, k2, k3, k4 = jax.random.split(key, 5)

    # Deterministic synthetic parameters (shapes implied by the conv head).
    w1 = jax.random.normal(k1, (9, CIN, HID), jnp.float32) * 0.1   # 3x3 conv, tap-major
    b1 = jax.random.normal(k2, (1, HID), jnp.float32) * 0.1
    w2 = jax.random.normal(k3, (HID, NCLS), jnp.float32) * 0.1     # 1x1 conv
    b2 = jax.random.normal(k4, (1, NCLS), jnp.float32) * 0.1
    params = (w1, b1, w2, b2)

    x = jax.random.normal(kx, (N, CIN, H, W), jnp.float32)         # NCHW input

    out = jax.block_until_ready(segmentation_model_output_wrapper(x, params))
    assert out.shape == (N, NCLS, H, W), out.shape

    ref = jax.block_until_ready(_reference(x, params))
    err = float(jnp.max(jnp.abs(out - ref)))
    # bf16 MXU operands -> compare against a matching bf16-rounded reference.
    assert jnp.allclose(out, ref, atol=5e-3, rtol=5e-3), err

    print("KERNEL_OK")
</pallas_src>

<mosaic_0001>
module attributes {stable_mosaic.version = 11 : i64} {
  func.func @_seg_head_kernel(%arg0: i32, %arg1: memref<37x512xbf16, #tpu.memory_space<vmem>>, %arg2: memref<33x37xbf16, #tpu.memory_space<vmem>>, %arg3: memref<8x33xbf16, #tpu.memory_space<vmem>>, %arg4: memref<2x8x256xf32, #tpu.memory_space<vmem>>) attributes {dimension_semantics = [#tpu.dimension_semantics<parallel>], iteration_bounds = array<i64: 1>, scalar_prefetch = 0 : i64, scratch_operands = 0 : i64, tpu.core_type = #tpu.core_type<tc>, window_params = [{transform_indices = @transform_0, window_bounds = array<i64: 37, 512>}, {pipeline_mode = #tpu.pipeline_mode<synchronous>, transform_indices = @transform_1, window_bounds = array<i64: 33, 37>}, {pipeline_mode = #tpu.pipeline_mode<synchronous>, transform_indices = @transform_2, window_bounds = array<i64: 8, 33>}, {transform_indices = @transform_3, window_bounds = array<i64: 2, 8, 256>}]} {
    %c0 = arith.constant 0 : index
    %c0_0 = arith.constant 0 : index
    %0 = vector.load %arg2[%c0, %c0_0] : memref<33x37xbf16, #tpu.memory_space<vmem>>, vector<33x37xbf16>
    %c0_1 = arith.constant 0 : index
    %c0_2 = arith.constant 0 : index
    %1 = vector.load %arg1[%c0_1, %c0_2] : memref<37x512xbf16, #tpu.memory_space<vmem>>, vector<37x512xbf16>
    %cst = arith.constant dense<0.000000e+00> : vector<33x512xf32>
    %2 = tpu.matmul %0, %1, %cst {dimension_numbers = #tpu.dot_dimension_numbers<[1], [0], [0], [1], [0, 0, 1, 1], [], []>} : vector<33x37xbf16>, vector<37x512xbf16>, vector<33x512xf32> -> vector<33x512xf32>
    %cst_3 = arith.constant 0.000000e+00 : f32
    %3 = vector.broadcast %cst_3 : f32 to vector<33x512xf32>
    %4 = arith.maximumf %2, %3 : vector<33x512xf32>
    %c0_4 = arith.constant 0 : index
    %c0_5 = arith.constant 0 : index
    %5 = vector.load %arg3[%c0_4, %c0_5] : memref<8x33xbf16, #tpu.memory_space<vmem>>, vector<8x33xbf16>
    %6 = arith.truncf %4 : vector<33x512xf32> to vector<33x512xbf16>
    %cst_6 = arith.constant dense<0.000000e+00> : vector<8x512xf32>
    %7 = tpu.matmul %5, %6, %cst_6 {dimension_numbers = #tpu.dot_dimension_numbers<[1], [0], [0], [1], [0, 0, 1, 1], [], []>} : vector<8x33xbf16>, vector<33x512xbf16>, vector<8x512xf32> -> vector<8x512xf32>
    %8 = vector.extract_strided_slice %7 {offsets = [0, 0], sizes = [8, 256], strides = [1, 1]} : vector<8x512xf32> to vector<8x256xf32>
    %c0_7 = arith.constant 0 : index
    %c0_8 = arith.constant 0 : index
    %c0_9 = arith.constant 0 : index
    %9 = vector.load %arg4[%c0_7, %c0_8, %c0_9] : memref<2x8x256xf32, #tpu.memory_space<vmem>>, vector<1x8x256xf32>
    %10 = vector.shape_cast %9 : vector<1x8x256xf32> to vector<8x256xf32>
    %11 = vector.shape_cast %8 : vector<8x256xf32> to vector<1x8x256xf32>
    tpu.vector_store %arg4[%c0_7, %c0_8, %c0_9], %11 {strides = array<i32>} : memref<2x8x256xf32, #tpu.memory_space<vmem>>, vector<1x8x256xf32>,
    %12 = vector.extract_strided_slice %7 {offsets = [0, 256], sizes = [8, 256], strides = [1, 1]} : vector<8x512xf32> to vector<8x256xf32>
    %c1 = arith.constant 1 : index
    %c0_10 = arith.constant 0 : index
    %c0_11 = arith.constant 0 : index
    %13 = vector.load %arg4[%c1, %c0_10, %c0_11] : memref<2x8x256xf32, #tpu.memory_space<vmem>>, vector<1x8x256xf32>
    %14 = vector.shape_cast %13 : vector<1x8x256xf32> to vector<8x256xf32>
    %15 = vector.shape_cast %12 : vector<8x256xf32> to vector<1x8x256xf32>
    tpu.vector_store %arg4[%c1, %c0_10, %c0_11], %15 {strides = array<i32>} : memref<2x8x256xf32, #tpu.memory_space<vmem>>, vector<1x8x256xf32>,
    return
  }
  func.func @transform_0(%arg0: i32) -> (i32, i32) {
    %c0_i32 = arith.constant 0 : i32
    %c0_i32_0 = arith.constant 0 : i32
    return %c0_i32, %arg0 : i32, i32
  }
  func.func @transform_1(%arg0: i32) -> (i32, i32) {
    %c0_i32 = arith.constant 0 : i32
    %c0_i32_0 = arith.constant 0 : i32
    %c0_i32_1 = arith.constant 0 : i32
    return %c0_i32, %c0_i32_0 : i32, i32
  }
  func.func @transform_2(%arg0: i32) -> (i32, i32) {
    %c0_i32 = arith.constant 0 : i32
    %c0_i32_0 = arith.constant 0 : i32
    %c0_i32_1 = arith.constant 0 : i32
    return %c0_i32, %c0_i32_0 : i32, i32
  }
  func.func @transform_3(%arg0: i32) -> (i32, i32, i32) {
    %c0_i32 = arith.constant 0 : i32
    %c0_i32_0 = arith.constant 0 : i32
    %c0_i32_1 = arith.constant 0 : i32
    return %arg0, %c0_i32, %c0_i32_0 : i32, i32, i32
  }
}

</mosaic_0001>

<bundles_post_ra>
// kernel: segmentation_model_output_wrapper.2
= control target key start
LH: loop header
LB: loop body
LE: loop exit
PB: predicated region body
PF: predicated region fallthrough
CT: control target
= control target key end

     0   :  { %s919_s0 = inlined_call_operand.vmem [shape: bf16[33,37], index: 0, kind: input, shape index: {}]   ;;  %s920_s1 = inlined_call_operand.vmem [shape: bf16[8,33], index: 1, kind: input, shape index: {}]   ;;  %s921_s2 = inlined_call_operand.vmem [shape: bf16[36,512], index: 2, kind: input, shape index: {}]   ;;  %s922_s3 = inlined_call_operand.<no memory space> [shape: bf16[], index: 3, kind: input, shape index: {}]   ;;  %s923_s4 = inlined_call_operand.vmem [shape: f32[2,8,256], index: 4, kind: output, shape index: {}]  }
   0x1   :  { %v9_v0 = vstv %s922_s3 }
   0x2   :  { %v10_v1 = vunpack.i.l.bf16 %v9_v0 }
   0x3   :  { %v719_v2 = vld [vmem:[%s921_s2 + $0x40] sm:$0xff]   ;;  %v255_v3 = vlaneseq  ;;  %v721_v4 = vld [vmem:[%s921_s2 + $0x48] sm:$0xff]   ;;  %v798_v6 = vld [vmem:[%s921_s2 + $0x30] sm:$0xff]   ;;  %v813_v17 = vmov 0   ;;  %v814_v23 = vmov 0.0   ;;  %vm423_vm1 = vcmask 1041408  }
   0x4   :  { %v797_v5 = vld [vmem:[%s921_s2 + $0x20] sm:$0xff]   ;;  %v253_v8 = vunpack.c.l.bf16 %v719_v2  ;;  %v276_v9 = vunpack.c.h.bf16 %v719_v2  ;;  %v299_v10 = vunpack.c.l.bf16 %v721_v4  ;;  %v322_v11 = vunpack.c.h.bf16 %v721_v4  ;;  %v800_v12 = vld [vmem:[%s921_s2 + $0x28] sm:$0xff]   ;;  %v801_v14 = vld [vmem:[%s921_s2 + $0x38] sm:$0xff]   ;;  %471 = vmatprep.mubr.bf16.mxu0 %v813_v17  ;;  %532 = vmatprep.mubr.bf16.mxu1 %v813_v17 }
   0x5   :  { %v256_v7 = vshrl.u32 %v255_v3, 7  ;;  %v20_v15 = vld [vmem:[%s921_s2] sm:$0xff]   ;;  %v805_v16 = vld [vmem:[%s921_s2 + $0x10] sm:$0xff]   ;;  %v806_v22 = vld [vmem:[%s921_s2 + $0x8] sm:$0xff]   ;;  %vm424_vm2 = vcmask 1042432   ;;  %v815_v29 = vmov 65535   ;;  %v731_v38 = vcombine.high %v797_v5, %v798_v6 }
   0x6   :  { %31 = vst [vmem:[#allocation7] sm:$0xff] %v20_v15   ;;  %v807_v28 = vld [vmem:[%s921_s2 + $0x18] sm:$0xff]   ;;  %v425_v30 = vsel %vm423_vm1, 4294967295, %v815_v29  ;;  %v733_v39 = vcombine.high %v800_v12, %v801_v14  ;;  %v730_v45 = vcombine.low %v797_v5, %v798_v6  ;;  %v732_v46 = vcombine.low %v800_v12, %v801_v14  ;;  %v810_v51 = vld [vmem:[%s919_s0] sm:$0xff]   ;;  %v811_v52 = vld [vmem:[%s919_s0 + $0x8] sm:$0xff]  }
   0x7   :  { %v257_v13 = vadd.s32 32, %v256_v7  ;;  %v426_v32 = vsel %vm424_vm2, %v425_v30, 0  ;;  %v729_v48 = vcombine.high %v806_v22, %v807_v28  ;;  %v728_v50 = vcombine.low %v806_v22, %v807_v28  ;;  %v812_v53 = vld [vmem:[%s919_s0 + $0x10] ss:$0 sps:$4 sm:$0x11]  }
   0x8   :  { %vm413_vm3 = vcmask 302080   ;;  %vm598_vm4 = vcmask 1040384   ;;  %vm594_vm5 = vcmask 269312  }
   0x9   :  { %vm258_vm0 = vcmp.lt.s32.totalorder %v257_v13, 36  ;;  %v600_v15 = vsel %vm598_vm4, 65535, %v813_v17 }
   0xa   :  { %v259_v18 = vsel %vm258_vm0, %v253_v8, %v10_v1  ;;  %v282_v19 = vsel %vm258_vm0, %v276_v9, %v10_v1  ;;  %v305_v20 = vsel %vm258_vm0, %v299_v10, %v10_v1  ;;  %v328_v21 = vsel %vm258_vm0, %v322_v11, %v10_v1 }
   0xb   :  { %v261_v24 = vpack.c.bf16 %v814_v23, %v259_v18  ;;  %v284_v25 = vpack.c.bf16 %v814_v23, %v282_v19  ;;  %v307_v26 = vpack.c.bf16 %v814_v23, %v305_v20  ;;  %v330_v27 = vpack.c.bf16 %v814_v23, %v328_v21 }
   0xd   :  { %264 = vst [vmem:[#allocation7 + $0x40] sm:$0xf] %v261_v24  ;;  %287 = vst [vmem:[#allocation7 + $0x44] sm:$0xf] %v284_v25  ;;  %v340_v44 = vld [vmem:[#allocation7] sm:$0xff] }
   0xe   :  { %310 = vst [vmem:[#allocation7 + $0x48] sm:$0xf] %v307_v26  ;;  %333 = vst [vmem:[#allocation7 + $0x4c] sm:$0xf] %v330_v27  ;;  %v727_v47 = vcombine.high %v340_v44, %v805_v16  ;;  %v726_v49 = vcombine.low %v340_v44, %v805_v16 }
  0x14   :  { %v348_v31 = vld [vmem:[#allocation7 + $0x40] sm:$0x77] }
  0x15   :  { %v349_v33 = vld [vmem:[#allocation7 + $0x48] sm:$0x77]  ;;  %v735_v34 = vcombine.high %v348_v31, %v348_v31  ;;  %v734_v36 = vcombine.low %v348_v31, %v348_v31 }
  0x16   :  { %v737_v35 = vcombine.high %v349_v33, %v349_v33  ;;  %v736_v37 = vcombine.low %v349_v33, %v349_v33 }
  0x17   :  { %v431_v40 = vand.u32 %v735_v34, %v426_v32  ;;  %v428_v42 = vand.u32 %v734_v36, %v426_v32 }
  0x18   :  { %v437_v41 = vand.u32 %v737_v35, %v426_v32  ;;  %v434_v43 = vand.u32 %v736_v37, %v426_v32 }
  0x19   :  { %449 = vmatprep.subr.bf16.mxu0 %v431_v40 }
  0x1a   :  { %510 = vmatprep.subr.bf16.mxu1 %v437_v41  ;;  %450 = vmatpush1.bf16.msra.mxu0 %v428_v42 }
  0x1b   :  { %511 = vmatpush1.bf16.msra.mxu1 %v434_v43  ;;  %451 = vmatprep.subr.bf16.mxu0 %v731_v38 }
  0x1c   :  { %512 = vmatprep.subr.bf16.mxu1 %v733_v39 }
  0x1e   :  { %452 = vmatpush1.bf16.msra.mxu0 %v730_v45 }
  0x1f   :  { %513 = vmatpush1.bf16.msra.mxu1 %v732_v46  ;;  %453 = vmatprep.subr.bf16.mxu0 %v727_v47 }
  0x20   :  { %514 = vmatprep.subr.bf16.mxu1 %v729_v48 }
  0x22   :  { %454 = vmatpush1.bf16.msra.mxu0 %v726_v49 }
  0x23   :  { %515 = vmatpush1.bf16.msra.mxu1 %v728_v50 }
  0x25   :  { %738 = vmatmul.mubr.msk.bf16.vlgmr.msra.gmra.mxu0 %vm413_vm3, %v810_v51 }
  0x26   :  { %741 = vmatmul.mubr.msk.bf16.vlgmr.msra.gmra.mxu1 %vm413_vm3, %v810_v51  ;;  %481 = vmatprep.mubr.bf16.mxu0 %v813_v17  ;;  %v581_v51 = vld [vmem:[%s920_s1] sm:$0xf] }
  0x27   :  { %542 = vmatprep.mubr.bf16.mxu1 %v813_v17 }
  0x2d   :  { %739 = vmatmul.mubr.msk.bf16.gmra.mxu0 %vm413_vm3, %v811_v52 }
  0x2e   :  { %742 = vmatmul.mubr.msk.bf16.gmra.mxu1 %vm413_vm3, %v811_v52  ;;  %491 = vmatprep.mubr.bf16.mxu0 %v813_v17 }
  0x2f   :  { %552 = vmatprep.mubr.bf16.mxu1 %v813_v17 }
  0x35   :  { %740 = vmatmul.mubr.msk.bf16.gmra.mxu0 %vm413_vm3, %v812_v53 }
  0x36   :  { %743 = vmatmul.mubr.msk.bf16.gmra.mxu1 %vm413_vm3, %v812_v53  ;;  %645 = vmatprep.mubr.bf16.mxu0 %v813_v17 }
  0x37   :  { %686 = vmatprep.mubr.bf16.mxu1 %v813_v17 }
  0xe5   :  { %v891_v54 = vpop.f32.mrf.mxu0 }
  0xe6   :  { %v893_v55 = vpop.f32.mrf.mxu1  ;;  %v561_v47 = vmax.f32 %v891_v54, 0.0 }
  0xe7   :  { %v475_v56 = vpop.f32.mrf.mxu0  ;;  %v563_v48 = vmax.f32 %v893_v55, 0.0 }
  0xe8   :  { %v536_v57 = vpop.f32.mrf.mxu1  ;;  %v562_v39 = vmax.f32 %v475_v56, 0.0 }
  0xe9   :  { %v895_v58 = vpop.f32.mrf.mxu0  ;;  %v564_v40 = vmax.f32 %v536_v57, 0.0 }
  0xea   :  { %v897_v59 = vpop.f32.mrf.mxu1  ;;  %v565_v41 = vmax.f32 %v895_v58, 0.0 }
  0xeb   :  { %v479_v60 = vpop.f32.mrf.mxu0  ;;  %v567_v42 = vmax.f32 %v897_v59, 0.0 }
  0xec   :  { %v540_v61 = vpop.f32.mrf.mxu1  ;;  %v566_v34 = vmax.f32 %v479_v60, 0.0  ;;  %v582_v49 = vpack.c.bf16 %v565_v41, %v561_v47 }
  0xed   :  { %v483_v62 = vpop.f32.mrf.mxu0  ;;  %v568_v35 = vmax.f32 %v540_v61, 0.0  ;;  %v584_v50 = vpack.c.bf16 %v567_v42, %v563_v48 }
  0xee   :  { %v544_v63 = vpop.f32.mrf.mxu1  ;;  %v569_v37 = vmax.f32 %v483_v62, 0.0  ;;  %v583_v45 = vpack.c.bf16 %v566_v34, %v562_v39 }
  0xef   :  { %v485_v0 = vpop.f32.mrf.mxu0  ;;  %v571_v38 = vmax.f32 %v544_v63, 0.0  ;;  %v585_v46 = vpack.c.bf16 %v568_v35, %v564_v40 }
  0xf0   :  { %v546_v1 = vpop.f32.mrf.mxu1  ;;  %v570_v26 = vmax.f32 %v485_v0, 0.0 }
  0xf1   :  { %v487_v2 = vpop.f32.mrf.mxu0  ;;  %v572_v27 = vmax.f32 %v546_v1, 0.0 }
  0xf2   :  { %v548_v3 = vpop.f32.mrf.mxu1  ;;  %v573_v30 = vmax.f32 %v487_v2, 0.0 }
  0xf3   :  { %v489_v4 = vpop.f32.mrf.mxu0  ;;  %v575_v31 = vmax.f32 %v548_v3, 0.0 }
  0xf4   :  { %v550_v5 = vpop.f32.mrf.mxu1  ;;  %v574_v20 = vmax.f32 %v489_v4, 0.0  ;;  %v586_v43 = vpack.c.bf16 %v573_v30, %v569_v37 }
  0xf5   :  { %v493_v6 = vpop.f32.mrf.mxu0  ;;  %v576_v21 = vmax.f32 %v550_v5, 0.0  ;;  %v588_v44 = vpack.c.bf16 %v575_v31, %v571_v38 }
  0xf6   :  { %v554_v7 = vpop.f32.mrf.mxu1  ;;  %v577_v8 = vmax.f32 %v493_v6, 0.0  ;;  %v587_v17 = vpack.c.bf16 %v574_v20, %v570_v26 }
  0xf7   :  { %v579_v9 = vmax.f32 %v554_v7, 0.0  ;;  %v495_v10 = vpop.f32.mrf.mxu0  ;;  %v589_v36 = vpack.c.bf16 %v576_v21, %v572_v27 }
  0xf8   :  { %v556_v11 = vpop.f32.mrf.mxu1  ;;  %v578_v12 = vmax.f32 %v495_v10, 0.0  ;;  %v590_v14 = vpack.c.bf16 %v577_v8, %v577_v8 }
  0xf9   :  { %v580_v13 = vmax.f32 %v556_v11, 0.0  ;;  %v592_v16 = vpack.c.bf16 %v579_v9, %v579_v9  ;;  %v497_v18 = vpop.f32.mrf.mxu0 }
  0xfa   :  { %v558_v19 = vpop.f32.mrf.mxu1  ;;  %v591_v22 = vpack.c.bf16 %v578_v12, %v578_v12  ;;  %v602_v32 = vand.u32 %v600_v15, %v590_v14 }
  0xfb   :  { %v593_v23 = vpack.c.bf16 %v580_v13, %v580_v13  ;;  %v498_v24 = vpop.f32.mrf.mxu0  ;;  %v608_v33 = vand.u32 %v600_v15, %v592_v16 }
  0xfc   :  { %v559_v25 = vpop.f32.mrf.mxu1  ;;  %v605_v28 = vand.u32 %v600_v15, %v591_v22 }
  0xfd   :  { %v611_v29 = vand.u32 %v600_v15, %v593_v23 }
  0xfe   :  { %623 = vmatprep.subr.bf16.mxu0 %v605_v28 }
  0xff   :  { %664 = vmatprep.subr.bf16.mxu1 %v611_v29  ;;  %624 = vmatpush1.bf16.msra.mxu0 %v602_v32 }
 0x100   :  { %665 = vmatpush1.bf16.msra.mxu1 %v608_v33  ;;  %625 = vmatprep.subr.bf16.mxu0 %v587_v17 }
 0x101   :  { %666 = vmatprep.subr.bf16.mxu1 %v589_v36 }
 0x103   :  { %626 = vmatpush1.bf16.msra.mxu0 %v586_v43 }
 0x104   :  { %667 = vmatpush1.bf16.msra.mxu1 %v588_v44  ;;  %627 = vmatprep.subr.bf16.mxu0 %v583_v45 }
 0x105   :  { %668 = vmatprep.subr.bf16.mxu1 %v585_v46 }
 0x107   :  { %628 = vmatpush1.bf16.msra.mxu0 %v582_v49 }
 0x108   :  { %669 = vmatpush1.bf16.msra.mxu1 %v584_v50 }
 0x10a   :  { %744 = vmatmul.mubr.msk.bf16.vlgmr.msra.gmra.mxu0 %vm594_vm5, %v581_v51 }
 0x10b   :  { %745 = vmatmul.mubr.msk.bf16.vlgmr.msra.gmra.mxu1 %vm594_vm5, %v581_v51 }
 0x1ca   :  { %v647_v52 = vpop.f32.mrf.mxu0 }
 0x1cb   :  { %v688_v53 = vpop.f32.mrf.mxu1  ;;  %695 = vst [vmem:[%s923_s4] sm:$0xff] %v647_v52 }
 0x1cc   :  { %746 = vst [vmem:[%s923_s4 + $0x10] sm:$0xff] %v688_v53  ;;  %v649_v54 = vpop.f32.mrf.mxu0 }
 0x1cd   :  { %v690_v55 = vpop.f32.mrf.mxu1  ;;  %696 = vst [vmem:[%s923_s4 + $0x8] sm:$0xff] %v649_v54 }
 0x1ce   :  { %747 = vst [vmem:[%s923_s4 + $0x18] sm:$0xff] %v690_v55  ;;  %v651_v56 = vpop.f32.mrf.mxu0 }
 0x1cf   :  { %v692_v57 = vpop.f32.mrf.mxu1 }
 0x1d0   :  { %v652_v58 = vpop.f32.mrf.mxu0 }
 0x1d1   :  { %v693_v59 = vpop.f32.mrf.mxu1 }

</bundles_post_ra>
